<compile_context>
chip_gen: v7x
topology: tpu7x:2x2x1
jax: 0.10.0
libtpu: 0.0.40
codegen_flags: <defaults>
</compile_context>

<pallas_src>
import functools

import jax
import jax.numpy as jnp
from jax.experimental import pallas as pl
from jax.experimental.pallas import tpu as pltpu

LANE = 128
SUBLANE = 8
TILE_ROWS = 8192               # (8192, 128) f32 block = 4 MiB per input
VMEM_LIMIT_BYTES = 32 << 20    # 2 inputs x 2 bufs x 4 MiB + acc fits all gens


@functools.lru_cache(maxsize=1)
def _num_tensorcores():
    """2 on two-TensorCore chips (v7x); 1 elsewhere (always a safe default)."""
    try:
        kind = jax.devices()[0].device_kind.lower()
    except Exception:
        return 1
    return 2 if "v7" in kind else 1


def _make_sse_kernel(rows, tile_rows, blocks_per_shard, num_full_blocks,
                     needs_mask):
    """Build the sum-of-squared-error kernel for a static tiling."""
    strips = tile_rows // SUBLANE

    def kernel(p_ref, g_ref, o_ref, acc_ref):
        shard = pl.program_id(0)
        step = pl.program_id(1)

        @pl.when(step == 0)
        def _init():
            acc_ref[...] = jnp.zeros_like(acc_ref)

        def diff():
            # Upcast after the block load: HBM traffic stays at native width.
            return (p_ref[...].astype(jnp.float32)
                    - g_ref[...].astype(jnp.float32))

        def accumulate(d):
            sq = d * d
            # Fold the (tile_rows, 128) tile into one vreg-sized strip with
            # pure VPU adds; keeps the accumulator tiny (independent of
            # tile_rows) and off the per-step VMEM load/store stream.
            acc_ref[...] += jnp.sum(sq.reshape(strips, SUBLANE, LANE), axis=0)

        if needs_mask:
            block_idx = shard * blocks_per_shard + step

            @pl.when(block_idx < num_full_blocks)
            def _interior():                 # hot path: sub / mul / add only
                accumulate(diff())

            @pl.when(block_idx >= num_full_blocks)
            def _edge():                     # partial last block + dummy blocks
                d = diff()
                row = jax.lax.broadcasted_iota(jnp.int32, (tile_rows, LANE), 0)
                global_row = block_idx * tile_rows + row
                # Mask before squaring so garbage VMEM never enters the sum.
                accumulate(jnp.where(global_row < rows, d, 0.0))
        else:
            accumulate(diff())

        @pl.when(step == pl.num_programs(1) - 1)
        def _finalize():
            o_ref[0, 0] = jnp.sum(acc_ref[...])   # one XLU reduce per shard

    return kernel


def _row_align(dtype):
    """Sublane multiple required by the packed layout of `dtype`."""
    return SUBLANE * max(1, 4 // jnp.dtype(dtype).itemsize)


def _sum_squared_error(pred_flat, gt_flat, *, min_pallas_elems=0,
                       tile_rows_cap=TILE_ROWS):
    """sum((pred - gt)^2) over two equal-length 1-D arrays via Pallas."""
    n = pred_flat.shape[0]
    assert gt_flat.shape[0] == n

    sse = jnp.float32(0.0)

    # <=127-element tail: tiny fused jnp reduction (no full-array jnp.pad copy).
    n_main = (n // LANE) * LANE
    if n_main != n:
        pt = pred_flat[n_main:].astype(jnp.float32)
        gt = gt_flat[n_main:].astype(jnp.float32)
        sse = sse + jnp.sum((pt - gt) ** 2)
    if n_main == 0:
        return sse

    pred_main = pred_flat if n_main == n else pred_flat[:n_main]
    gt_main = gt_flat if n_main == n else gt_flat[:n_main]

    rows = n_main // LANE
    align = max(_row_align(pred_flat.dtype), _row_align(gt_flat.dtype))
    tile_rows = min((tile_rows_cap // align) * align, (rows // align) * align)

    # Tiny inputs: fused XLA reduction beats the pallas_call fixed cost.
    if tile_rows == 0 or n_main < min_pallas_elems:
        pm = pred_main.astype(jnp.float32)
        gm = gt_main.astype(jnp.float32)
        return sse + jnp.sum((pm - gm) ** 2)

    p2d = pred_main.reshape(rows, LANE)
    g2d = gt_main.reshape(rows, LANE)

    num_blocks = pl.cdiv(rows, tile_rows)
    num_shards = _num_tensorcores()            # 1 on v5e/v6e, 2 on v7x
    if num_blocks < num_shards:
        num_shards = 1
    blocks_per_shard = pl.cdiv(num_blocks, num_shards)
    num_full_blocks = rows // tile_rows
    needs_mask = (rows % tile_rows != 0) or (
        num_shards * blocks_per_shard != num_blocks)

    def in_map(shard, step):
        # Dummy trailing blocks of the last shard clamp onto the last real
        # block; their contribution is masked out inside the kernel.
        return (jnp.minimum(shard * blocks_per_shard + step, num_blocks - 1), 0)

    kernel = _make_sse_kernel(rows, tile_rows, blocks_per_shard,
                              num_full_blocks, needs_mask)

    partial = pl.pallas_call(
        kernel,
        out_shape=jax.ShapeDtypeStruct((num_shards, 1), jnp.float32),
        grid_spec=pltpu.PrefetchScalarGridSpec(
            num_scalar_prefetch=0,
            grid=(num_shards, blocks_per_shard),
            in_specs=[
                pl.BlockSpec((tile_rows, LANE), in_map),
                pl.BlockSpec((tile_rows, LANE), in_map),
            ],
            out_specs=pl.BlockSpec((1, 1), lambda shard, step: (shard, 0),
                                   memory_space=pltpu.SMEM),
            scratch_shapes=[pltpu.VMEM((SUBLANE, LANE), jnp.float32)],
        ),
        compiler_params=pltpu.CompilerParams(
            dimension_semantics=("parallel", "arbitrary"),
            vmem_limit_bytes=VMEM_LIMIT_BYTES),
    )(p2d, g2d)
    return sse + jnp.sum(partial)


def metrics_forward(preds, targets, global_step=0, epoch=0, data_range=1.0,
                    min_pallas_elems=1 << 20):
    """JAX/Pallas equivalent of Metrics.forward (no_grad + PSNR)."""
    del global_step, epoch  # only used for experiment logging in the original

    def as_kernel_float(x):
        # Keep native floating dtypes (bf16 stays bf16 -> half the HBM reads);
        # only integer / 64-bit inputs get a wrapper-side cast.
        if (not jnp.issubdtype(x.dtype, jnp.floating)
                or jnp.dtype(x.dtype).itemsize > 4):
            return x.astype(jnp.float32)
        return x

    pred_rgb = as_kernel_float(preds["rgb"])
    gt_rgb = as_kernel_float(targets["gt.rgb"]).reshape(-1, 3)

    pred_flat = pred_rgb.reshape(-1)
    gt_flat = gt_rgb.reshape(-1)
    n = pred_flat.shape[0]        # torchmetrics PSNR: MSE over all elements

    sse = _sum_squared_error(pred_flat, gt_flat,
                             min_pallas_elems=min_pallas_elems)
    mse = sse / jnp.float32(n)
    psnr = 10.0 * jnp.log10(jnp.float32(data_range) ** 2 / mse)

    # TODO(synk): comet_utils.log_dict (experiment logging side-effect) has no
    # Pallas/JAX equivalent and is intentionally omitted.
    return {"metrics/psnr": psnr}


if __name__ == "__main__":
    root_key = jax.random.PRNGKey(0)

    def run_case(B, H, W):
        k1, k2 = jax.random.split(jax.random.fold_in(root_key, B * H * W))
        N = B * H * W
        pred_rgb = jax.random.uniform(k1, (N, 3), dtype=jnp.float32)      # preds['rgb']
        gt_rgb = jax.random.uniform(k2, (B, H, W, 3), dtype=jnp.float32)  # targets['gt.rgb']

        # Force the Pallas path even at small sizes so the kernel is exercised.
        out = metrics_forward({"rgb": pred_rgb}, {"gt.rgb": gt_rgb},
                              global_step=0, epoch=0, min_pallas_elems=0)
        psnr = jax.block_until_ready(out["metrics/psnr"])

        # Pure-JAX reference (torchmetrics PSNR semantics, data_range=1.0).
        mse_ref = jnp.mean((pred_rgb - gt_rgb.reshape(-1, 3)) ** 2)
        psnr_ref = 10.0 * jnp.log10(1.0 / mse_ref)
        assert jnp.allclose(psnr, psnr_ref, rtol=1e-5, atol=1e-4), (
            (B, H, W), psnr, psnr_ref)

    # Small shapes from the module spec (rays x 3 channels).
    run_case(2, 16, 16)    # rows=12   -> partial last block, masked edge path
    run_case(2, 64, 64)    # rows=192  -> single full block, unmasked fast path
    run_case(1, 256, 192)  # rows=1152 -> single larger block

    # Multi-block accumulation + shard / dummy-block path with a reduced tile
    # cap so the test stays small.
    k1, k2 = jax.random.split(root_key)
    p = jax.random.uniform(k1, (1152 * LANE,), dtype=jnp.float32)
    g = jax.random.uniform(k2, (1152 * LANE,), dtype=jnp.float32)
    sse = jax.block_until_ready(
        _sum_squared_error(p, g, min_pallas_elems=0, tile_rows_cap=256))
    sse_ref = jnp.sum((p - g) ** 2)
    assert jnp.allclose(sse, sse_ref, rtol=1e-4, atol=1e-2), (sse, sse_ref)

    # Non-multiple-of-128 length exercises the pad-free tail path.
    k3, k4 = jax.random.split(jax.random.fold_in(root_key, 7))
    pt = jax.random.uniform(k3, (12 * LANE + 37,), dtype=jnp.float32)
    gt = jax.random.uniform(k4, (12 * LANE + 37,), dtype=jnp.float32)
    sse_t = jax.block_until_ready(
        _sum_squared_error(pt, gt, min_pallas_elems=0))
    sse_t_ref = jnp.sum((pt - gt) ** 2)
    assert jnp.allclose(sse_t, sse_t_ref, rtol=1e-4, atol=1e-3), (sse_t, sse_t_ref)

    # bf16 inputs exercise the in-kernel upcast (native-width HBM reads).
    pb = jax.random.uniform(k3, (64 * LANE,), dtype=jnp.float32).astype(jnp.bfloat16)
    gb = jax.random.uniform(k4, (64 * LANE,), dtype=jnp.float32).astype(jnp.bfloat16)
    sse_b = jax.block_until_ready(
        _sum_squared_error(pb, gb, min_pallas_elems=0, tile_rows_cap=32))
    sse_b_ref = jnp.sum((pb.astype(jnp.float32) - gb.astype(jnp.float32)) ** 2)
    assert jnp.allclose(sse_b, sse_b_ref, rtol=1e-4, atol=1e-2), (sse_b, sse_b_ref)

    # Default entry point (small-input fallback: fused jnp reduction, no kernel).
    k5, k6 = jax.random.split(jax.random.fold_in(root_key, 11))
    pred_rgb = jax.random.uniform(k5, (2 * 16 * 16, 3), dtype=jnp.float32)
    gt_rgb = jax.random.uniform(k6, (2, 16, 16, 3), dtype=jnp.float32)
    out = metrics_forward({"rgb": pred_rgb}, {"gt.rgb": gt_rgb},
                          global_step=0, epoch=0)
    jax.block_until_ready(out["metrics/psnr"])

    print("KERNEL_OK")
</pallas_src>

<mosaic_0001>
module attributes {stable_mosaic.version = 11 : i64} {
  func.func @kernel(%arg0: i32, %arg1: i32, %arg2: memref<8x128xf32, #tpu.memory_space<vmem>>, %arg3: memref<8x128xf32, #tpu.memory_space<vmem>>, %arg4: memref<1x1xf32, #tpu.memory_space<smem>>, %arg5: memref<8x128xf32, #tpu.memory_space<vmem>>) attributes {dimension_semantics = [#tpu.dimension_semantics<parallel>, #tpu.dimension_semantics<arbitrary>], iteration_bounds = array<i64: 1, 2>, scalar_prefetch = 0 : i64, scratch_operands = 1 : i64, tpu.core_type = #tpu.core_type<tc>, window_params = [{transform_indices = @transform_0, window_bounds = array<i64: 8, 128>}, {transform_indices = @transform_1, window_bounds = array<i64: 8, 128>}, {transform_indices = @transform_2, window_bounds = array<i64: 1, 1>}]} {
    %c0_i32 = arith.constant 0 : i32
    %0 = arith.cmpi eq, %arg1, %c0_i32 : i32
    %1 = arith.extui %0 : i1 to i32
    %c0_i32_0 = arith.constant 0 : i32
    %2 = arith.cmpi ne, %1, %c0_i32_0 : i32
    scf.if %2 {
      %cst = arith.constant 0.000000e+00 : f32
      %14 = vector.broadcast %cst : f32 to vector<8x128xf32>
      %c0 = arith.constant 0 : index
      %c0_6 = arith.constant 0 : index
      %15 = vector.load %arg5[%c0, %c0_6] : memref<8x128xf32, #tpu.memory_space<vmem>>, vector<8x128xf32>
      tpu.vector_store %arg5[%c0, %c0_6], %14 {strides = array<i32>} : memref<8x128xf32, #tpu.memory_space<vmem>>, vector<8x128xf32>,
    } else {
    }
    %c2_i32 = arith.constant 2 : i32
    %3 = arith.muli %arg0, %c2_i32 : i32
    %4 = arith.addi %3, %arg1 : i32
    %c1_i32 = arith.constant 1 : i32
    %5 = arith.cmpi slt, %4, %c1_i32 : i32
    %6 = arith.extui %5 : i1 to i32
    %c0_i32_1 = arith.constant 0 : i32
    %7 = arith.cmpi ne, %6, %c0_i32_1 : i32
    scf.if %7 {
      %c0 = arith.constant 0 : index
      %c0_6 = arith.constant 0 : index
      %14 = vector.load %arg2[%c0, %c0_6] : memref<8x128xf32, #tpu.memory_space<vmem>>, vector<8x128xf32>
      %c0_7 = arith.constant 0 : index
      %c0_8 = arith.constant 0 : index
      %15 = vector.load %arg3[%c0_7, %c0_8] : memref<8x128xf32, #tpu.memory_space<vmem>>, vector<8x128xf32>
      %16 = arith.subf %14, %15 : vector<8x128xf32>
      %17 = arith.mulf %16, %16 : vector<8x128xf32>
      %c0_9 = arith.constant 0 : index
      %c0_10 = arith.constant 0 : index
      %18 = vector.load %arg5[%c0_9, %c0_10] : memref<8x128xf32, #tpu.memory_space<vmem>>, vector<8x128xf32>
      %19 = vector.shape_cast %17 : vector<8x128xf32> to vector<1x8x128xf32>
      %cst = arith.constant dense<0.000000e+00> : vector<8x128xf32>
      %20 = vector.multi_reduction <add>, %19, %cst [0] : vector<1x8x128xf32> to vector<8x128xf32>
      %21 = arith.addf %18, %20 : vector<8x128xf32>
      %c0_11 = arith.constant 0 : index
      %c0_12 = arith.constant 0 : index
      %22 = vector.load %arg5[%c0_11, %c0_12] : memref<8x128xf32, #tpu.memory_space<vmem>>, vector<8x128xf32>
      tpu.vector_store %arg5[%c0_11, %c0_12], %21 {strides = array<i32>} : memref<8x128xf32, #tpu.memory_space<vmem>>, vector<8x128xf32>,
    } else {
    }
    %c1_i32_2 = arith.constant 1 : i32
    %8 = arith.cmpi sge, %4, %c1_i32_2 : i32
    %9 = arith.extui %8 : i1 to i32
    %c0_i32_3 = arith.constant 0 : i32
    %10 = arith.cmpi ne, %9, %c0_i32_3 : i32
    scf.if %10 {
      %c0 = arith.constant 0 : index
      %c0_6 = arith.constant 0 : index
      %14 = vector.load %arg2[%c0, %c0_6] : memref<8x128xf32, #tpu.memory_space<vmem>>, vector<8x128xf32>
      %c0_7 = arith.constant 0 : index
      %c0_8 = arith.constant 0 : index
      %15 = vector.load %arg3[%c0_7, %c0_8] : memref<8x128xf32, #tpu.memory_space<vmem>>, vector<8x128xf32>
      %16 = arith.subf %14, %15 : vector<8x128xf32>
      %17 = tpu.iota {dimensions = array<i32: 0>} : vector<8x128xi32>
      %c8_i32 = arith.constant 8 : i32
      %18 = arith.muli %4, %c8_i32 : i32
      %19 = vector.broadcast %18 : i32 to vector<8x128xi32>
      %20 = arith.addi %19, %17 : vector<8x128xi32>
      %c12_i32 = arith.constant 12 : i32
      %21 = vector.broadcast %c12_i32 : i32 to vector<8x128xi32>
      %22 = arith.cmpi slt, %20, %21 : vector<8x128xi32>
      %cst = arith.constant 0.000000e+00 : f32
      %23 = vector.broadcast %cst : f32 to vector<8x128xf32>
      %24 = arith.select %22, %16, %23 : vector<8x128xi1>, vector<8x128xf32>
      %25 = arith.mulf %24, %24 : vector<8x128xf32>
      %c0_9 = arith.constant 0 : index
      %c0_10 = arith.constant 0 : index
      %26 = vector.load %arg5[%c0_9, %c0_10] : memref<8x128xf32, #tpu.memory_space<vmem>>, vector<8x128xf32>
      %27 = vector.shape_cast %25 : vector<8x128xf32> to vector<1x8x128xf32>
      %cst_11 = arith.constant dense<0.000000e+00> : vector<8x128xf32>
      %28 = vector.multi_reduction <add>, %27, %cst_11 [0] : vector<1x8x128xf32> to vector<8x128xf32>
      %29 = arith.addf %26, %28 : vector<8x128xf32>
      %c0_12 = arith.constant 0 : index
      %c0_13 = arith.constant 0 : index
      %30 = vector.load %arg5[%c0_12, %c0_13] : memref<8x128xf32, #tpu.memory_space<vmem>>, vector<8x128xf32>
      tpu.vector_store %arg5[%c0_12, %c0_13], %29 {strides = array<i32>} : memref<8x128xf32, #tpu.memory_space<vmem>>, vector<8x128xf32>,
    } else {
    }
    %c1_i32_4 = arith.constant 1 : i32
    %11 = arith.cmpi eq, %arg1, %c1_i32_4 : i32
    %12 = arith.extui %11 : i1 to i32
    %c0_i32_5 = arith.constant 0 : i32
    %13 = arith.cmpi ne, %12, %c0_i32_5 : i32
    scf.if %13 {
      %c0 = arith.constant 0 : index
      %c0_6 = arith.constant 0 : index
      %14 = vector.load %arg5[%c0, %c0_6] : memref<8x128xf32, #tpu.memory_space<vmem>>, vector<8x128xf32>
      %15 = vector.shape_cast %14 : vector<8x128xf32> to vector<1x8x128xf32>
      %cst = arith.constant dense<0.000000e+00> : vector<1xf32>
      %16 = vector.multi_reduction <add>, %15, %cst [1, 2] : vector<1x8x128xf32> to vector<1xf32>
      %17 = vector.shape_cast %16 : vector<1xf32> to vector<1x1x1xf32>
      %18 = vector.extract %17[0, 0, 0] : f32 from vector<1x1x1xf32>
      %c0_7 = arith.constant 0 : index
      %c0_8 = arith.constant 0 : index
      %19 = memref.load %arg4[%c0_7, %c0_8] : memref<1x1xf32, #tpu.memory_space<smem>>
      memref.store %18, %arg4[%c0_7, %c0_8] : memref<1x1xf32, #tpu.memory_space<smem>>
    } else {
    }
    return
  }
  func.func @transform_0(%arg0: i32, %arg1: i32) -> (i32, i32) {
    %c2_i32 = arith.constant 2 : i32
    %0 = arith.muli %arg0, %c2_i32 : i32
    %1 = arith.addi %0, %arg1 : i32
    %c1_i32 = arith.constant 1 : i32
    %2 = arith.minsi %1, %c1_i32 : i32
    %c0_i32 = arith.constant 0 : i32
    %c0_i32_0 = arith.constant 0 : i32
    return %2, %c0_i32 : i32, i32
  }
  func.func @transform_1(%arg0: i32, %arg1: i32) -> (i32, i32) {
    %c2_i32 = arith.constant 2 : i32
    %0 = arith.muli %arg0, %c2_i32 : i32
    %1 = arith.addi %0, %arg1 : i32
    %c1_i32 = arith.constant 1 : i32
    %2 = arith.minsi %1, %c1_i32 : i32
    %c0_i32 = arith.constant 0 : i32
    %c0_i32_0 = arith.constant 0 : i32
    return %2, %c0_i32 : i32, i32
  }
  func.func @transform_2(%arg0: i32, %arg1: i32) -> (i32, i32) {
    %c0_i32 = arith.constant 0 : i32
    %c0_i32_0 = arith.constant 0 : i32
    return %arg0, %c0_i32 : i32, i32
  }
}

</mosaic_0001>

<bundles_post_ra>
// kernel: tpu_custom_call.1
= control target key start
LH: loop header
LB: loop body
LE: loop exit
PB: predicated region body
PF: predicated region fallthrough
CT: control target
= control target key end

     0   :  { %7 = vsyncpa [#allocation4], 0  ;;  %s806_s0 = inlined_call_operand.hbm [shape: f32[12,128], index: 0, kind: input, shape index: {}]   ;;  %s807_s1 = inlined_call_operand.hbm [shape: f32[12,128], index: 1, kind: input, shape index: {}]   ;;  %s808_s2 = inlined_call_operand.hbm [shape: f32[1,1], index: 2, kind: output, shape index: {}]  }
   0x1   :  { %9 = vsyncpa [#allocation4 + $0x1], 0 }
   0x2   :  { %10 = vsyncpa [#allocation7], 0 }
   0x3   :  { %12 = vsyncpa [#allocation7 + $0x1], 0 }
   0x4   :  { %13 = vsyncpa [#allocation5], 0  ;;  %s619_s9 = smov 0   ;;  %s621_s10 = smov 0  }
   0x5   :  { %s623_s11 = smov 0   ;;  %s625_s12 = smov 0  }
   0x6   :  { %s627_s13 = smov 0   ;;  %s629_s14 = smov 0  }
   0x7 LB: > { %s379_s15 = sadd.s32 4294967295, %s598_s14   ;;  %s28_s16 = sadd.s32 1, %s594_s13  ;;  %s598_s14 = sphi %s629_s14, %s19_s14   ;;  %s594_s13 = sphi %s627_s13, %s821_s13   ;;  %s590_s12 = sphi %s625_s12, %s820_s12   ;;  %s586_s11 = sphi %s623_s11, %s819_s11   ;;  %s582_s10 = sphi %s621_s10, %s818_s10   ;;  %s578_s9 = sphi %s619_s9, %s817_s9  }
   0x8   : > { %p29_p0 = scmp.ge.s32.totalorder %s28_s16, 2  ;;  %p37_p1 = scmp.lt.s32.totalorder %s594_s13, 1 }
   0x9   : > { %s46_s17 = sadd.s32 1, %s586_s11  ;;  %p53_p2 = scmp.ne.s32.totalorder %s586_s11, %s582_s10 }
   0xa   : > { %s823_s16 = smov (%p29_p0, %s28_s16), 0  ;;  %p54_p4 = scmp.eq.s32.totalorder %s598_s14, 0 }
   0xb   : > { %s656_s18 = scalar_select %p37_p1, %s594_s13, 1 }
   0xc   : > { %p41_p3 = scmp.lt.s32.totalorder %s823_s16, 1  ;;  %p59_p5 = scmp.ne.s32.totalorder %s582_s10, %s578_s9 }
   0xd   : > { %p60_p6 = scmp.eq.s32.totalorder %s379_s15, 0  ;;  %p55_p7 = por %p54_p4, %p53_p2 }
   0xe   : > { %s42_s19 = scalar_select %p41_p3, %s823_s16, 1 }
   0xf   : > { %p664_p8 = por %p60_p6, %p59_p5  ;;  %p415_p10 = scmp.lt.s32.totalorder %s598_s14, 2 }
  0x10   : > { %s43_s21 = ssub.s32 %s656_s18, %s42_s19  ;;  %s671_s22 = sand.u32 1, %s586_s11  }
  0x11   : > { %s810_s20 = scalar_select %p664_p8, 1, 0 }
  0x12   : > { %p44_p9 = scmp.eq.s32.totalorder %s43_s21, 0  ;;  %s383_s23 = sshll.u32 %s656_s18, 7 }
  0x13   : > { %s382_s25 = sshll.u32 %s671_s22, 3  ;;  %s683_s28 = scalar_lea.hbm %s806_s0, %s383_s23 }
  0x14   : > { %s675_s24 = scalar_select %p44_p9, %s586_s11, %s46_s17  }
  0x15   : > { %s147_s29 = scalar_lea.vmem [#allocation3], %s382_s25  ;;  %p687_p11 = pnand %p415_p10, %p55_p7 }
  0x16   : > { %s158_s30 = sshll.u32 %s147_s29, 4  ;;  %s144_s4 = scalar_lea.sflag [#allocation4], %s671_s22  ;;  %s691_s30 = int_to_ptr.vmem [resolvable:$true] %s158_s30 }
  0x17   : > { %s468_s5 = scalar_lea.hbm %s683_s28, 128  ;;  %p470_p1 = pneg %p687_p11 }
  0x18   : > { %p469_p0 = scmp.ne.s32.totalorder %s683_s28, %s468_s5  ;;  %s473_s8 = scalar_lea.hbm %s806_s0, 256 }
  0x19   : > { %p474_p4 = scmp.lt.u32.totalorder %s683_s28, %s806_s0  ;;  %p475_p5 = scmp.lt.u32.totalorder %s473_s8, %s468_s5 }
  0x1a   : > { %p471_p2 = pnand %p470_p1, %p469_p0  ;;  %p477_p7 = scmp.lt.u32.totalorder %s468_s5, %s683_s28 }
  0x1b   : > { %p476_p6 = por %p475_p5, %p474_p4 }
  0x1c   : > { %p472_p3 = pneg %p471_p2 }
  0x1d   : > { %p478_p9 = por %p477_p7, %p476_p6 }
  0x1f   : > { %p479_p10 = pnand %p478_p9, %p472_p3 }
  0x21   : > { %482 = shalt.err (!%p479_p10)
}
  0x22   : > { %s483_s19 = scalar_lea.vmem %s691_s30, 128  ;;  %s600_s21 = smov [#allocation3]  }
  0x23   : > { %p484_p0 = scmp.ne.s32.totalorder %s691_s30, %s483_s19  ;;  %s488_s26 = sshll.u32 %s600_s21, 4  ;;  %s489_s26 = int_to_ptr.vmem [resolvable:$false] %s488_s26 }
  0x24   : > { %s490_s27 = scalar_lea.vmem %s489_s26, 256  ;;  %p491_p13 = scmp.lt.s32.totalorder %s691_s30, %s489_s26 }
  0x25   : > { %p486_p2 = pnand %p484_p0, %p470_p1  ;;  %p492_p4 = scmp.lt.s32.totalorder %s490_s27, %s483_s19 }
  0x27   : > { %p487_p12 = pneg %p486_p2  ;;  %p493_p5 = por %p492_p4, %p491_p13 }
  0x29   : > { %p494_p6 = pnand %p493_p5, %p487_p12 }
  0x2b   : > { %497 = shalt.err (!%p494_p6)
}
  0x2c   : > { %411 = dma.hbm_to_vmem [thread:$0]  (!%p687_p11), %s683_s28, 128, %s691_s30, %s144_s4  }
  0x2d   : > { %p812_p3 = scmp.lt.s32.totalorder %s598_s14, 3  ;;  %p813_p7 = scmp.ge.s32.totalorder %s598_s14, 1 }
  0x2e   : > { %s734_s7 = scalar_lea.hbm %s807_s1, %s383_s23  ;;  %s169_s8 = scalar_lea.vmem [#allocation6], %s382_s25 }
  0x2f   : > { %p725_p9 = pnand %p813_p7, %p812_p3  ;;  %s180_s9 = sshll.u32 %s169_s8, 4  ;;  %s181_s9 = int_to_ptr.vmem [resolvable:$true] %s180_s9 }
  0x30   : > { %s166_s28 = scalar_lea.sflag [#allocation7], %s671_s22  ;;  %s498_s30 = scalar_lea.hbm %s734_s7, 128 }
  0x31   : > { %s814_s29 = scalar_select %p725_p9, 1, 0 }
  0x32   : > { %p499_p12 = scmp.ne.s32.totalorder %s734_s7, %s498_s30  ;;  %s503_s23 = scalar_lea.hbm %s807_s1, 256 }
  0x33   : > { %p504_p0 = scmp.lt.u32.totalorder %s734_s7, %s807_s1  ;;  %p505_p2 = scmp.lt.u32.totalorder %s503_s23, %s498_s30 }
  0x34   : > { %p501_p13 = pnand %p499_p12, %p470_p1  ;;  %p507_p5 = scmp.lt.u32.totalorder %s498_s30, %s734_s7 }
  0x35   : > { %p506_p4 = por %p505_p2, %p504_p0 }
  0x36   : > { %p502_p10 = pneg %p501_p13 }
  0x37   : > { %p508_p6 = por %p507_p5, %p506_p4 }
  0x39   : > { %p509_p3 = pnand %p508_p6, %p502_p10 }
  0x3b   : > { %512 = shalt.err (!%p509_p3)
}
  0x3c   : > { %s513_s22 = scalar_lea.vmem %s181_s9, 128  ;;  %s601_s25 = smov [#allocation6]  }
  0x3d   : > { %p514_p7 = scmp.ne.s32.totalorder %s181_s9, %s513_s22  ;;  %s518_s21 = sshll.u32 %s601_s25, 4  ;;  %s519_s21 = int_to_ptr.vmem [resolvable:$false] %s518_s21 }
  0x3e   : > { %s520_s26 = scalar_lea.vmem %s519_s21, 256  ;;  %p521_p8 = scmp.lt.s32.totalorder %s181_s9, %s519_s21 }
  0x3f   : > { %p516_p12 = pnand %p514_p7, %p470_p1  ;;  %p522_p9 = scmp.lt.s32.totalorder %s520_s26, %s513_s22 }
  0x41   : > { %p517_p13 = pneg %p516_p12  ;;  %p523_p0 = por %p522_p9, %p521_p8 }
  0x43   : > { %p524_p2 = pnand %p523_p0, %p517_p13 }
  0x45   : > { %527 = shalt.err (!%p524_p2)
}
  0x46   : > { %414 = dma.hbm_to_vmem [thread:$0]  (!%p687_p11), %s734_s7, 128, %s181_s9, %s166_s28  }
  0x47   : > { %p815_p10 = scmp.ne.s32.totalorder %s814_s29, 0 }
  0x48   : > { %s191_s27 = sand.u32 (!%p815_p10), 1, %s582_s10   ;;  %p816_p1 = scmp.ne.s32.totalorder (!%p815_p10), %s810_s20, 0 }
  0x49   : > { %189 = sbr.rel (%p815_p10) target bundleno = 342 (0x156), region = 28  ;;  %s387_s5 = sshll.u32 (!%p815_p10), %s191_s27, 3 }
  0x4a   : > { %s192_s6 = scalar_lea.sflag (!%p815_p10), [#allocation4], %s191_s27  ;;  %s195_s8 = scalar_lea.vmem (!%p815_p10), [#allocation3], %s387_s5 }
  0x50   : > { %565 = dma.done.wait (%p816_p1), %s192_s6, 128  }
  0x51   : > { %567 = vsyncadd (%p816_p1), %s192_s6, 4294967168  ;;  %s201_s30 = scalar_lea.sflag [#allocation7], %s191_s27  ;;  %s204_s18 = scalar_lea.vmem [#allocation6], %s387_s5 }
  0x52   : > { %569 = dma.done.wait (%p816_p1), %s201_s30, 128  }
  0x53   : > { %571 = vsyncadd (%p816_p1), %s201_s30, 4294967168  ;;  %p389_p8 = scmp.ne.s32.totalorder %s590_s12, 0 }
  0x54   : > { %v602_v0 = vmov (!%p389_p8), 0.0  }
  0x55   : > { %236 = sbr.rel (%p389_p8) target bundleno = 92 (0x5c), region = 40  ;;  %237 = vst [vmem:[#allocation2] sm:$0xff] (!%p389_p8), %v602_v0 }
  0x5c PF: > { %p390_p11 = scmp.ge.s32.totalorder %s590_s12, 1 }
  0x5d   : > { %v244_v1 = vld [vmem:[%s195_s8] sm:$0xff] (!%p390_p11)  ;;  %v245_v2 = vld [vmem:[%s204_s18] sm:$0xff] (!%p390_p11) }
  0x5e   : > { %243 = sbr.rel (%p390_p11) target bundleno = 101 (0x65), region = 44  ;;  %v246_v3 = vsub.f32 (!%p390_p11), %v244_v1, %v245_v2  ;;  %v248_v4 = vld [vmem:[#allocation2] sm:$0xff] (!%p390_p11) }
  0x60   : > { %v247_v5 = vmul.f32 (!%p390_p11), %v246_v3, %v246_v3 }
  0x62   : > { %v250_v6 = vadd.f32 (!%p390_p11), %v248_v4, %v247_v5 }
  0x64   : > { %251 = vst [vmem:[#allocation2] sm:$0xff] (!%p390_p11), %v250_v6 }
  0x65 PF: > { %p391_p9 = scmp.lt.s32.totalorder %s590_s12, 1 }
  0x66   : > { %v256_v7 = vld [vmem:[%s195_s8] sm:$0xff] (!%p391_p9)  ;;  %v257_v8 = vld [vmem:[%s204_s18] sm:$0xff] (!%p391_p9)  ;;  %v259_v9 = vlaneseq (!%p391_p9)  ;;  %s392_s20 = sshll.u32 (!%p391_p9), %s590_s12, 3 }
  0x67   : > { %255 = sbr.rel (%p391_p9) target bundleno = 115 (0x73), region = 48  ;;  %v262_v10 = vstv (!%p391_p9), %s392_s20  ;;  %v258_v12 = vsub.f32 (!%p391_p9), %v256_v7, %v257_v8 }
  0x68   : > { %v260_v11 = vshrl.u32 (!%p391_p9), %v259_v9, 7 }
  0x6a   : > { %v263_v13 = vadd.s32 (!%p391_p9), %v262_v10, %v260_v11 }
  0x6b   : > { %v267_v15 = vld [vmem:[#allocation2] sm:$0xff] (!%p391_p9) }
  0x6c   : > { %vm264_vm0 = vcmp.lt.s32.totalorder (!%p391_p9), %v263_v13, 12 }
  0x6d   : > { %v265_v14 = vsel (!%p391_p9), %vm264_vm0, %v258_v12, 0.0 }
  0x6e   : > { %v266_v16 = vmul.f32 %v265_v14, %v265_v14 }
  0x70   : > { %v269_v17 = vadd.f32 %v267_v15, %v266_v16 }
  0x72   : > { %270 = vst [vmem:[#allocation2] sm:$0xff] %v269_v17 }
  0x73 PF: > { %p393_p4 = scmp.ne.s32.totalorder %s590_s12, 1 }
  0x75   : > { %274 = sbr.rel (%p393_p4) target bundleno = 327 (0x147), region = 52 }
  0x79   : > { %v275_v18 = vld [vmem:[#allocation2] sm:$0xff] (!%p393_p4) }
  0x7a   : > { %276 = vadd.xlane.f32.xlu0 (!%p393_p4), %v275_v18 }
 0x107   : > { %v277_v19 = vpop.xlane.xlu0 %276 }
 0x108   : > { %v278_v20 = vrot.slane %v277_v19, 4 }
 0x10a   : > { %v279_v21 = vadd.f32 %v278_v20, %v277_v19 }
 0x10c   : > { %v280_v22 = vrot.slane %v279_v21, 2 }
 0x10e   : > { %v281_v23 = vadd.f32 %v280_v22, %v279_v21 }
 0x110   : > { %v282_v24 = vrot.slane %v281_v23, 1 }
 0x112   : > { %v283_v25 = vadd.f32 %v282_v24, %v281_v23 }
 0x114   : > { %398 = vpush %v283_v25 }
 0x145   : > { %s399_s3 = spop %398 }
 0x146   : > { %286 = sst [smem:[#allocation8]] %s399_s3 }
 0x147 PF: > { %p416_p5 = scmp.eq.s32.totalorder %s379_s15, 1  ;;  %s528_s12 = scalar_lea.hbm %s808_s2, 16 }
 0x148   : > { %p529_p6 = scmp.ne.s32.totalorder %s808_s2, %s528_s12  ;;  %p534_p12 = scmp.lt.u32.totalorder %s528_s12, %s808_s2 }
 0x14a   : > { %p530_p3 = pnand %p529_p6, %p416_p5 }
 0x14c   : > { %p531_p7 = pneg %p530_p3 }
 0x14e   : > { %p536_p13 = pnand %p534_p12, %p531_p7 }
 0x150   : > { %539 = shalt.err (!%p536_p13)
}
 0x151   : > { %s603_s17 = smov [#allocation8]  }
 0x152   : > { %405 = dma.smem_to_hbm (%p416_p5), %s603_s17, 16, %s808_s2, [#allocation5]  }
 0x153   : > { %573 = dma.done.wait (%p416_p5), [#allocation5], 16  }
 0x154   : > { %575 = vsyncadd (%p416_p5), [#allocation5], 4294967280 }
 0x155   : > { %302 = sfence }
 0x156 PF: > { %s19_s14 = sadd.s32 1, %s598_s14   ;;  %s817_s9 = smov %s582_s10 }
 0x157   : > { %p16_p0 = scmp.ge.s32.totalorder %s19_s14, 4   ;;  %s818_s10 = smov %s586_s11 }
 0x158   : > { %s819_s11 = smov %s675_s24  ;;  %s820_s12 = smov %s594_s13 }
 0x159   : > { %s821_s13 = smov %s823_s16  ;;  %18 = sbr.rel (!%p16_p0) target bundleno = 7 (0x7), region = 96 }
 0x160   :  { %308 = vsyncpa [#allocation4], 1 }
 0x161   :  { %310 = vsyncpa [#allocation4 + $0x1], 1 }
 0x162   :  { %311 = vsyncpa [#allocation7], 1 }
 0x163   :  { %313 = vsyncpa [#allocation7 + $0x1], 1 }
 0x164   :  { %314 = vsyncpa [#allocation5], 1 }
 0x165   :  { %316 = vsyncpa [#allocation5 + $0x1], 1 }

</bundles_post_ra>
